<compile_context>
chip_gen: v5e
topology: v5e:2x2
jax: 0.10.0
libtpu: 0.0.40
codegen_flags: <defaults>
</compile_context>

<pallas_src>
import functools

import jax
import jax.numpy as jnp
from jax.experimental import pallas as pl
from jax.experimental.pallas import tpu as pltpu


_VGG_MEAN = (0.485, 0.456, 0.406)
_VGG_STD = (0.229, 0.224, 0.225)
_VGG_SIZE = 512
_VGG_LAYER_WEIGHTS = (1.0,)          # vgg_weights=[1], vgg_layers='relu4_4'

_TILE_ROWS_MAX = 2048                # (3, 2048, 128) f32 = 3 MiB per input block
_VMEM_LIMIT_BYTES = 32 * 1024 * 1024 # >= v5e's 16 MiB default; <= v7x physical


# ------------------------------ Pallas kernel --------------------------------

def _fused_wmse_kernel(x_ref, y_ref, o_ref, *, channel_scales):
    """Weighted squared-difference partial sums for one (1, C, TR, 128) block.

    o[(1,1,1,128)] = sum_c s_c * sum_rows (x_c - y_c)^2
    `channel_scales` are compile-time Python floats (a_c^2 = 0.25/std_c^2 folded
    from the cancelled VGG preprocessing affine).  Cast to f32 happens here so
    bf16 inputs only pay half the HBM read traffic.
    """
    acc = jnp.zeros((1, 128), jnp.float32)
    for c, s in enumerate(channel_scales):          # C=3, unrolled at trace time
        d = x_ref[0, c].astype(jnp.float32) - y_ref[0, c].astype(jnp.float32)
        acc = acc + s * jnp.sum(d * d, axis=0, keepdims=True)
    o_ref[...] = acc.reshape(o_ref.shape)


# ------------------------------ kernel wrapper --------------------------------

def _weighted_sqdiff_mean(x, y, channel_scales):
    """mean over all elements of s_c * (x - y)^2, one fused Pallas pass."""
    assert x.shape == y.shape
    n, c, h, w = x.shape
    hw = h * w

    rows = pl.cdiv(hw, 128)
    tile_rows = min(_TILE_ROWS_MAX, ((rows + 7) // 8) * 8)
    rows_pad = ((rows + tile_rows - 1) // tile_rows) * tile_rows
    hw_pad = rows_pad * 128

    if hw_pad == hw:
        x4 = x.reshape(n, c, rows_pad, 128)
        y4 = y.reshape(n, c, rows_pad, 128)
    else:
        # Rare fallback (h*w not 128-aligned): zero padding gives zero diff, so
        # the partial sums are unchanged; we still divide by the TRUE count.
        pad = ((0, 0), (0, 0), (0, hw_pad - hw))
        x4 = jnp.pad(x.reshape(n, c, hw), pad).reshape(n, c, rows_pad, 128)
        y4 = jnp.pad(y.reshape(n, c, hw), pad).reshape(n, c, rows_pad, 128)

    n_tiles = rows_pad // tile_rows
    kernel = functools.partial(_fused_wmse_kernel, channel_scales=channel_scales)

    partials = pl.pallas_call(
        kernel,
        out_shape=jax.ShapeDtypeStruct((n, n_tiles, 1, 128), jnp.float32),
        grid_spec=pltpu.PrefetchScalarGridSpec(
            num_scalar_prefetch=0,
            grid=(n, n_tiles),
            in_specs=[
                pl.BlockSpec((1, c, tile_rows, 128), lambda b, t: (b, 0, t, 0)),
                pl.BlockSpec((1, c, tile_rows, 128), lambda b, t: (b, 0, t, 0)),
            ],
            out_specs=pl.BlockSpec((1, 1, 1, 128), lambda b, t: (b, t, 0, 0)),
        ),
        compiler_params=pltpu.CompilerParams(
            dimension_semantics=("parallel", "parallel"),
            vmem_limit_bytes=_VMEM_LIMIT_BYTES),
    )(x4, y4)

    # Tiny cross-lane / cross-tile reduce + mean normalization in the wrapper.
    return jnp.sum(partials) / (n * c * hw)


def _nearest_resize(x, size):
    """F.interpolate(x, size) default 'nearest' mode, NCHW (plain JAX gather)."""
    n, c, h, w = x.shape
    oh, ow = size
    hi = jnp.floor(jnp.arange(oh, dtype=jnp.float32) * (h / oh)).astype(jnp.int32)
    wi = jnp.floor(jnp.arange(ow, dtype=jnp.float32) * (w / ow)).astype(jnp.int32)
    return x[:, :, hi, :][:, :, :, wi]


# ------------------------------- module forward -------------------------------

def flow_vgg_supervised_loss(flow, flow_gt, img, label, h_ori, w_ori):
    """JAX/Pallas equivalent of flow_vgg_supervised_loss.forward."""
    del img, label, h_ori, w_ori             # unused by the reference forward
    n, c, h, w = flow.shape

    # VggLoss small-image gate: height < 128 -> zero loss, shape (1,).
    # (Loss kept in float32; torch tracks the input dtype via .to(x).)
    if h < 128:
        return jnp.zeros((1,), jnp.float32)

    x, y = flow, flow_gt
    if h > _VGG_SIZE:
        # Nearest resize is a pure gather; it commutes with the (cancelled)
        # elementwise affine, so applying it on the raw tensors is exact.
        x = _nearest_resize(x, (_VGG_SIZE, _VGG_SIZE))
        y = _nearest_resize(y, (_VGG_SIZE, _VGG_SIZE))
    assert x.shape[1] == 3 and y.shape[1] == 3, "VGG model takes 3 channel images."

    # TODO(synk): pretrained VGG16 'relu4_4' feature extractor (VggLoss.vgg_model)
    # requires external torchvision weights that cannot be built in-script, so the
    # perceptual features are an identity stub.  With identity features the
    # per-channel affine ((v+1)*0.5 - mean)/std applied to BOTH inputs cancels
    # inside the MSE:  MSE(a*x+b, a*y+b) == mean(a_c^2*(x-y)^2), a_c = 0.5/std_c.
    # We therefore skip the preprocessing pass entirely and bake a_c^2 into the
    # fused squared-difference kernel.  This identity MUST be reverted when real
    # VGG features (bf16 implicit-GEMM convs on the MXU) are added.
    channel_scales = tuple(0.25 / (s * s) for s in _VGG_STD)

    mse = _weighted_sqdiff_mean(x, y, channel_scales)
    loss = sum(_VGG_LAYER_WEIGHTS) * mse         # single stub layer => one MSE
    return loss.reshape(1).astype(jnp.float32)


# -------------------- pure-JAX reference of the implemented part --------------

def _reference_implemented(x_raw, y_raw):
    mean = jnp.asarray(_VGG_MEAN, jnp.float32).reshape(1, 3, 1, 1)
    std = jnp.asarray(_VGG_STD, jnp.float32).reshape(1, 3, 1, 1)
    x = ((x_raw.astype(jnp.float32) + 1.0) * 0.5 - mean) / std
    y = ((y_raw.astype(jnp.float32) + 1.0) * 0.5 - mean) / std
    return jnp.mean((x - y) ** 2).reshape(1)


if __name__ == "__main__":
    key = jax.random.PRNGKey(0)
    k1, k2, k3, k4 = jax.random.split(key, 4)

    # Case 1: spec-faithful small shapes (H=16 < 128 -> VggLoss returns zeros(1)).
    N, H, W = 2, 16, 16
    flow = jnp.tanh(jax.random.normal(k1, (N, 2, H, W), dtype=jnp.float32))
    flow_gt = jnp.tanh(jax.random.normal(k2, (N, 2, H, W), dtype=jnp.float32))
    img = jax.random.uniform(k3, (N, 3, H, W), dtype=jnp.float32)
    label = jax.random.uniform(k4, (N, 3, H, W), dtype=jnp.float32)
    out_small = jax.block_until_ready(
        flow_vgg_supervised_loss(flow, flow_gt, img, label, H, W))
    assert out_small.shape == (1,) and float(out_small[0]) == 0.0, out_small

    # Case 2: exercise the fused Pallas kernel on the non-trivial path
    # (3 channels, H=W=128 so the gate passes; VGG features are the stub).
    H2 = W2 = 128
    x2 = jnp.tanh(jax.random.normal(k1, (N, 3, H2, W2), dtype=jnp.float32))
    y2 = jnp.tanh(jax.random.normal(k2, (N, 3, H2, W2), dtype=jnp.float32))
    img2 = jax.random.uniform(k3, (N, 3, H2, W2), dtype=jnp.float32)
    lab2 = jax.random.uniform(k4, (N, 3, H2, W2), dtype=jnp.float32)
    out_big = jax.block_until_ready(
        flow_vgg_supervised_loss(x2, y2, img2, lab2, H2, W2))
    ref = jax.block_until_ready(_reference_implemented(x2, y2))
    assert jnp.allclose(out_big, ref, atol=1e-4, rtol=1e-4), (out_big, ref)

    # Case 3: ragged spatial size (h*w not a multiple of 128) -> padding fallback.
    H3, W3 = 136, 130
    x3 = jnp.tanh(jax.random.normal(k1, (N, 3, H3, W3), dtype=jnp.float32))
    y3 = jnp.tanh(jax.random.normal(k2, (N, 3, H3, W3), dtype=jnp.float32))
    img3 = jax.random.uniform(k3, (N, 3, H3, W3), dtype=jnp.float32)
    lab3 = jax.random.uniform(k4, (N, 3, H3, W3), dtype=jnp.float32)
    out_rag = jax.block_until_ready(
        flow_vgg_supervised_loss(x3, y3, img3, lab3, H3, W3))
    ref_rag = jax.block_until_ready(_reference_implemented(x3, y3))
    assert jnp.allclose(out_rag, ref_rag, atol=1e-4, rtol=1e-4), (out_rag, ref_rag)

    print("KERNEL_OK")
</pallas_src>

<mosaic_0001>
module attributes {stable_mosaic.version = 11 : i64} {
  func.func @_fused_wmse_kernel(%arg0: i32, %arg1: i32, %arg2: memref<1x3x128x128xf32, #tpu.memory_space<vmem>>, %arg3: memref<1x3x128x128xf32, #tpu.memory_space<vmem>>, %arg4: memref<1x1x1x128xf32, #tpu.memory_space<vmem>>) attributes {dimension_semantics = [#tpu.dimension_semantics<parallel>, #tpu.dimension_semantics<parallel>], iteration_bounds = array<i64: 2, 1>, scalar_prefetch = 0 : i64, scratch_operands = 0 : i64, tpu.core_type = #tpu.core_type<tc>, window_params = [{transform_indices = @transform_0, window_bounds = array<i64: 1, 3, 128, 128>}, {transform_indices = @transform_1, window_bounds = array<i64: 1, 3, 128, 128>}, {transform_indices = @transform_2, window_bounds = array<i64: 1, 1, 1, 128>}]} {
    %cst = arith.constant 0.000000e+00 : f32
    %0 = vector.broadcast %cst : f32 to vector<1x128xf32>
    %c0 = arith.constant 0 : index
    %c0_0 = arith.constant 0 : index
    %c0_1 = arith.constant 0 : index
    %c0_2 = arith.constant 0 : index
    %1 = vector.load %arg2[%c0, %c0_0, %c0_1, %c0_2] : memref<1x3x128x128xf32, #tpu.memory_space<vmem>>, vector<1x1x128x128xf32>
    %2 = vector.shape_cast %1 : vector<1x1x128x128xf32> to vector<128x128xf32>
    %c0_3 = arith.constant 0 : index
    %c0_4 = arith.constant 0 : index
    %c0_5 = arith.constant 0 : index
    %c0_6 = arith.constant 0 : index
    %3 = vector.load %arg3[%c0_3, %c0_4, %c0_5, %c0_6] : memref<1x3x128x128xf32, #tpu.memory_space<vmem>>, vector<1x1x128x128xf32>
    %4 = vector.shape_cast %3 : vector<1x1x128x128xf32> to vector<128x128xf32>
    %5 = arith.subf %2, %4 : vector<128x128xf32>
    %6 = arith.mulf %5, %5 : vector<128x128xf32>
    %cst_7 = arith.constant dense<0.000000e+00> : vector<128xf32>
    %7 = vector.multi_reduction <add>, %6, %cst_7 [0] : vector<128x128xf32> to vector<128xf32>
    %8 = vector.shape_cast %7 : vector<128xf32> to vector<1x128xf32>
    %cst_8 = arith.constant 4.76726246 : f32
    %9 = vector.broadcast %cst_8 : f32 to vector<1x128xf32>
    %10 = arith.mulf %9, %8 : vector<1x128xf32>
    %11 = arith.addf %0, %10 : vector<1x128xf32>
    %c0_9 = arith.constant 0 : index
    %c1 = arith.constant 1 : index
    %c0_10 = arith.constant 0 : index
    %c0_11 = arith.constant 0 : index
    %12 = vector.load %arg2[%c0_9, %c1, %c0_10, %c0_11] : memref<1x3x128x128xf32, #tpu.memory_space<vmem>>, vector<1x1x128x128xf32>
    %13 = vector.shape_cast %12 : vector<1x1x128x128xf32> to vector<128x128xf32>
    %c0_12 = arith.constant 0 : index
    %c1_13 = arith.constant 1 : index
    %c0_14 = arith.constant 0 : index
    %c0_15 = arith.constant 0 : index
    %14 = vector.load %arg3[%c0_12, %c1_13, %c0_14, %c0_15] : memref<1x3x128x128xf32, #tpu.memory_space<vmem>>, vector<1x1x128x128xf32>
    %15 = vector.shape_cast %14 : vector<1x1x128x128xf32> to vector<128x128xf32>
    %16 = arith.subf %13, %15 : vector<128x128xf32>
    %17 = arith.mulf %16, %16 : vector<128x128xf32>
    %cst_16 = arith.constant dense<0.000000e+00> : vector<128xf32>
    %18 = vector.multi_reduction <add>, %17, %cst_16 [0] : vector<128x128xf32> to vector<128xf32>
    %19 = vector.shape_cast %18 : vector<128xf32> to vector<1x128xf32>
    %cst_17 = arith.constant 4.98246193 : f32
    %20 = vector.broadcast %cst_17 : f32 to vector<1x128xf32>
    %21 = arith.mulf %20, %19 : vector<1x128xf32>
    %22 = arith.addf %11, %21 : vector<1x128xf32>
    %c0_18 = arith.constant 0 : index
    %c2 = arith.constant 2 : index
    %c0_19 = arith.constant 0 : index
    %c0_20 = arith.constant 0 : index
    %23 = vector.load %arg2[%c0_18, %c2, %c0_19, %c0_20] : memref<1x3x128x128xf32, #tpu.memory_space<vmem>>, vector<1x1x128x128xf32>
    %24 = vector.shape_cast %23 : vector<1x1x128x128xf32> to vector<128x128xf32>
    %c0_21 = arith.constant 0 : index
    %c2_22 = arith.constant 2 : index
    %c0_23 = arith.constant 0 : index
    %c0_24 = arith.constant 0 : index
    %25 = vector.load %arg3[%c0_21, %c2_22, %c0_23, %c0_24] : memref<1x3x128x128xf32, #tpu.memory_space<vmem>>, vector<1x1x128x128xf32>
    %26 = vector.shape_cast %25 : vector<1x1x128x128xf32> to vector<128x128xf32>
    %27 = arith.subf %24, %26 : vector<128x128xf32>
    %28 = arith.mulf %27, %27 : vector<128x128xf32>
    %cst_25 = arith.constant dense<0.000000e+00> : vector<128xf32>
    %29 = vector.multi_reduction <add>, %28, %cst_25 [0] : vector<128x128xf32> to vector<128xf32>
    %30 = vector.shape_cast %29 : vector<128xf32> to vector<1x128xf32>
    %cst_26 = arith.constant 4.93827152 : f32
    %31 = vector.broadcast %cst_26 : f32 to vector<1x128xf32>
    %32 = arith.mulf %31, %30 : vector<1x128xf32>
    %33 = arith.addf %22, %32 : vector<1x128xf32>
    %34 = vector.shape_cast %33 : vector<1x128xf32> to vector<1x1x1x128xf32>
    %c0_27 = arith.constant 0 : index
    %c0_28 = arith.constant 0 : index
    %c0_29 = arith.constant 0 : index
    %c0_30 = arith.constant 0 : index
    %35 = vector.load %arg4[%c0_27, %c0_28, %c0_29, %c0_30] : memref<1x1x1x128xf32, #tpu.memory_space<vmem>>, vector<1x1x1x128xf32>
    tpu.vector_store %arg4[%c0_27, %c0_28, %c0_29, %c0_30], %34 {strides = array<i32>} : memref<1x1x1x128xf32, #tpu.memory_space<vmem>>, vector<1x1x1x128xf32>,
    return
  }
  func.func @transform_0(%arg0: i32, %arg1: i32) -> (i32, i32, i32, i32) {
    %c0_i32 = arith.constant 0 : i32
    %c0_i32_0 = arith.constant 0 : i32
    %c0_i32_1 = arith.constant 0 : i32
    return %arg0, %c0_i32, %arg1, %c0_i32_0 : i32, i32, i32, i32
  }
  func.func @transform_1(%arg0: i32, %arg1: i32) -> (i32, i32, i32, i32) {
    %c0_i32 = arith.constant 0 : i32
    %c0_i32_0 = arith.constant 0 : i32
    %c0_i32_1 = arith.constant 0 : i32
    return %arg0, %c0_i32, %arg1, %c0_i32_0 : i32, i32, i32, i32
  }
  func.func @transform_2(%arg0: i32, %arg1: i32) -> (i32, i32, i32, i32) {
    %c0_i32 = arith.constant 0 : i32
    %c0_i32_0 = arith.constant 0 : i32
    %c0_i32_1 = arith.constant 0 : i32
    return %arg0, %arg1, %c0_i32, %c0_i32_0 : i32, i32, i32, i32
  }
}

</mosaic_0001>

<bundles_post_ra>
// kernel: tpu_custom_call.1
= control target key start
LH: loop header
LB: loop body
LE: loop exit
PB: predicated region body
PF: predicated region fallthrough
CT: control target
= control target key end

     0   :  { %7 = vsyncpa [#allocation3], 0  ;;  %s1167_s0 = inlined_call_operand.hbm [shape: f32[2,3,128,128], index: 0, kind: input, shape index: {}]   ;;  %s1168_s1 = inlined_call_operand.hbm [shape: f32[2,3,128,128], index: 1, kind: input, shape index: {}]   ;;  %s1169_s2 = inlined_call_operand.hbm [shape: f32[2,1,1,128], index: 2, kind: output, shape index: {}]  }
   0x1   :  { %9 = vsyncpa [#allocation3 + $0x1], 0 }
   0x2   :  { %10 = vsyncpa [#allocation6], 0 }
   0x3   :  { %12 = vsyncpa [#allocation6 + $0x1], 0 }
   0x4   :  { %13 = vsyncpa [#allocation4], 0 }
   0x5   :  { %15 = vsyncpa [#allocation4 + $0x1], 0  ;;  %s925_s9 = smov 0   ;;  %s927_s10 = smov 0  }
   0x6   :  { %s929_s11 = smov 0   ;;  %s931_s12 = smov 0  }
   0x7   :  { %s933_s13 = smov 0   ;;  %s935_s14 = smov 0  }
   0x8 LB: > { %s613_s15 = sadd.s32 4294967295, %s906_s14   ;;  %s614_s16 = sadd.s32 4294967294, %s906_s14   ;;  %s906_s14 = sphi %s935_s14, %s21_s14   ;;  %s902_s13 = sphi %s933_s13, %s1179_s13   ;;  %s898_s12 = sphi %s931_s12, %s1178_s12   ;;  %s894_s11 = sphi %s929_s11, %s1177_s11   ;;  %s890_s10 = sphi %s927_s10, %s1176_s10   ;;  %s886_s9 = sphi %s925_s9, %s1175_s9  }
   0x9   : > { %s33_s17 = sadd.s32 1, %s902_s13  ;;  %s42_s18 = sadd.s32 1, %s894_s11 }
   0xa   : > { %p35_p0 = scmp.ge.s32.totalorder %s33_s17, 2  ;;  %p49_p1 = scmp.ne.s32.totalorder %s894_s11, %s890_s10 }
   0xb   : > { %p50_p2 = scmp.eq.s32.totalorder %s906_s14, 0  ;;  %p55_p3 = scmp.ne.s32.totalorder %s890_s10, %s886_s9 }
   0xc   : > { %s1181_s17 = smov (%p35_p0, %s33_s17), 0  ;;  %p56_p5 = scmp.eq.s32.totalorder %s613_s15, 0 }
   0xd   : > { %p966_p4 = por %p50_p2, %p49_p1  ;;  %s37_s20 = ssub.s32 %s902_s13, %s1181_s17 }
   0xe   : > { %p109_p6 = scmp.eq.s32.totalorder %s613_s15, 1  ;;  %p40_p7 = scmp.eq.s32.totalorder %s37_s20, 0 }
   0xf   : > { %p972_p8 = por %p56_p5, %p55_p3  ;;  %p115_p10 = scmp.eq.s32.totalorder %s614_s16, 1 }
  0x10   : > { %p976_p9 = por %p109_p6, %p49_p1  ;;  %p616_p12 = scmp.ge.s32.totalorder %s906_s14, 2 }
  0x11   : > { %s981_s23 = scalar_select %p40_p7, %s894_s11, %s42_s18  }
  0x12   : > { %p983_p11 = por %p115_p10, %p55_p3  ;;  %p708_p13 = scmp.lt.s32.totalorder %s906_s14, 2 }
  0x13   : > { %s990_s25 = sand.u32 1, %s894_s11   ;;  %s687_s27 = smul.u32 384, %s902_s13 }
  0x14   : > { %s686_s26 = smul.u32 384, %s990_s25  ;;  %p996_p0 = pnand %p708_p13, %p966_p4 }
  0x15   : > { %s146_s3 = scalar_lea.hbm %s1167_s0, %s687_s27  ;;  %p619_p1 = scmp.ge.s32.totalorder %s906_s14, 1 }
  0x16   : > { %s139_s4 = scalar_lea.vmem [#allocation2], %s686_s26  ;;  %s147_s6 = sshll.u32 %s146_s3, 4  ;;  %s148_s6 = int_to_ptr.hbm [resolvable:$true] %s147_s6 }
  0x17   : > { %s149_s5 = sshll.u32 %s139_s4, 4  ;;  %s136_s7 = scalar_lea.sflag [#allocation3], %s990_s25  ;;  %s150_s5 = int_to_ptr.vmem [resolvable:$true] %s149_s5 }
  0x18   : > { %s908_s8 = smov 128   ;;  %s909_s15 = smov 8  }
  0x19   : > { %700 = dma.hbm_to_vmem [thread:$0]  (!%p996_p0), %s148_s6, 6144, %s150_s5, %s136_s7, %s908_s8, %s908_s8, %s909_s15  }
  0x1a   : > { %p181_p2 = scmp.lt.s32.totalorder %s906_s14, 3  ;;  %s170_s19 = scalar_lea.hbm %s1168_s1, %s687_s27 }
  0x1b   : > { %s171_s20 = sshll.u32 %s170_s19, 4  ;;  %s163_s29 = scalar_lea.vmem [#allocation5], %s686_s26  ;;  %s172_s20 = int_to_ptr.hbm [resolvable:$true] %s171_s20 }
  0x1c   : > { %p182_p3 = pnand %p619_p1, %p181_p2  ;;  %s173_s30 = sshll.u32 %s163_s29, 4  ;;  %s174_s30 = int_to_ptr.vmem [resolvable:$true] %s173_s30 }
  0x1d   : > { %s160_s3 = scalar_lea.sflag [#allocation6], %s990_s25  ;;  %s1015_s4 = sand.u32 (!%p182_p3), 1, %s890_s10  }
  0x1e   : > { %703 = dma.hbm_to_vmem [thread:$0]  (!%p996_p0), %s172_s20, 6144, %s174_s30, %s160_s3, %s908_s8, %s908_s8, %s909_s15  }
  0x1f   : > { %185 = sbr.rel (%p182_p3) target bundleno = 112 (0x70), region = 28  ;;  %s188_s6 = scalar_lea.sflag (!%p182_p3), [#allocation3], %s1015_s4 }
  0x20   : > { %s690_s5 = smul.u32 (!%p182_p3), 384, %s1015_s4 }
  0x22   : > { %s1019_s7 = scalar_lea.vmem (!%p182_p3), [#allocation2], %s690_s5 }
  0x24   : > { %873 = dma.done.wait (%p972_p8), %s188_s6, 6144  }
  0x25   : > { %875 = vsyncadd (%p972_p8), %s188_s6, 4294961152  ;;  %s198_s25 = scalar_lea.sflag [#allocation6], %s1015_s4  ;;  %s1026_s26 = scalar_lea.vmem [#allocation5], %s690_s5 }
  0x26   : > { %877 = dma.done.wait (%p972_p8), %s198_s25, 6144  }
  0x27   : > { %879 = vsyncadd (%p972_p8), %s198_s25, 4294961152  ;;  %v229_v0 = vld [vmem:[%s1019_s7] sm:$0xff]  ;;  %v230_v1 = vld [vmem:[%s1019_s7 + $0x8] sm:$0xff]  ;;  %s505_s28 = scalar_lea.hbm %s1169_s2, %s898_s12  ;;  %s226_s8 = scalar_lea.vmem [#allocation7], %s1015_s4 }
  0x28   : > { %v231_v2 = vld [vmem:[%s1019_s7 + $0x10] sm:$0xff]  ;;  %v245_v3 = vld [vmem:[%s1026_s26] sm:$0xff]  ;;  %v246_v4 = vld [vmem:[%s1026_s26 + $0x8] sm:$0xff]  ;;  %s507_s15 = sshll.u32 %s226_s8, 4  ;;  %s509_s16 = sshll.u32 %s505_s28, 4  ;;  %s508_s15 = int_to_ptr.vmem [resolvable:$true] %s507_s15  ;;  %s510_s16 = int_to_ptr.hbm [resolvable:$true] %s509_s16 }
  0x29   : > { %v247_v5 = vld [vmem:[%s1026_s26 + $0x10] sm:$0xff]  ;;  %v261_v6 = vsub.f32 %v229_v0, %v245_v3  ;;  %v262_v7 = vsub.f32 %v230_v1, %v246_v4  ;;  %v232_v8 = vld [vmem:[%s1019_s7 + $0x18] sm:$0xff]  ;;  %v233_v11 = vld [vmem:[%s1019_s7 + $0x20] sm:$0xff]  ;;  %s496_s18 = scalar_lea.sflag [#allocation4], %s1015_s4  ;;  %s834_s19 = sshra.s32 %s510_s16, 4  ;;  %s835_s19 = int_to_ptr.hbm [resolvable:$true] %s834_s19 }
  0x2a   : > { %v248_v9 = vld [vmem:[%s1026_s26 + $0x18] sm:$0xff]  ;;  %v263_v10 = vsub.f32 %v231_v2, %v247_v5  ;;  %v249_v12 = vld [vmem:[%s1026_s26 + $0x20] sm:$0xff]  ;;  %v234_v16 = vld [vmem:[%s1019_s7 + $0x28] sm:$0xff]  ;;  %s836_s20 = scalar_lea.hbm %s835_s19, 1  ;;  %s840_s30 = scalar_lea.hbm %s1169_s2, 2 }
  0x2b   : > { %v264_v13 = vsub.f32 %v232_v8, %v248_v9  ;;  %v277_v14 = vmul.f32 %v261_v6, %v261_v6  ;;  %v278_v15 = vmul.f32 %v262_v7, %v262_v7  ;;  %v250_v17 = vld [vmem:[%s1026_s26 + $0x28] sm:$0xff]  ;;  %v265_v18 = vsub.f32 %v233_v11, %v249_v12  ;;  %v235_v20 = vld [vmem:[%s1019_s7 + $0x30] sm:$0xff]  ;;  %v236_v22 = vld [vmem:[%s1019_s7 + $0x38] sm:$0xff]  ;;  %p837_p4 = scmp.ne.s32.totalorder %s835_s19, %s836_s20  ;;  %p841_p7 = scmp.lt.s32.totalorder %s835_s19, %s1169_s2 }
  0x2c   : > { %v279_v19 = vmul.f32 %v263_v10, %v263_v10  ;;  %v251_v21 = vld [vmem:[%s1026_s26 + $0x30] sm:$0xff]  ;;  %v252_v23 = vld [vmem:[%s1026_s26 + $0x38] sm:$0xff]  ;;  %v266_v24 = vsub.f32 %v234_v16, %v250_v17  ;;  %v620_v27 = vld [vmem:[%s1019_s7 + $0x80] sm:$0xff]  ;;  %p842_p8 = scmp.lt.s32.totalorder %s840_s30, %s836_s20 }
  0x2d   : > { %v280_v25 = vmul.f32 %v264_v13, %v264_v13  ;;  %v293_v26 = vadd.f32 %v278_v15, %v277_v14  ;;  %v621_v28 = vld [vmem:[%s1019_s7 + $0x88] sm:$0xff]  ;;  %v237_v29 = vld [vmem:[%s1019_s7 + $0x40] sm:$0xff]  ;;  %v267_v30 = vsub.f32 %v235_v20, %v251_v21  ;;  %v281_v31 = vmul.f32 %v265_v18, %v265_v18  ;;  %v622_v37 = vld [vmem:[%s1019_s7 + $0x90] sm:$0xff]  ;;  %p838_p5 = pnand %p837_p4, %p976_p9 }
  0x2e   : > { %v636_v33 = vld [vmem:[%s1026_s26 + $0x80] sm:$0xff]  ;;  %v637_v34 = vld [vmem:[%s1026_s26 + $0x88] sm:$0xff]  ;;  %v268_v36 = vsub.f32 %v236_v22, %v252_v23  ;;  %v638_v38 = vld [vmem:[%s1026_s26 + $0x90] sm:$0xff]  ;;  %v282_v41 = vmul.f32 %v266_v24, %v266_v24  ;;  %p843_p10 = por %p842_p8, %p841_p7 }
  0x2f   : > { %v294_v32 = vadd.f32 %v293_v26, %v279_v19  ;;  %v253_v35 = vld [vmem:[%s1026_s26 + $0x40] sm:$0xff]  ;;  %v238_v39 = vld [vmem:[%s1019_s7 + $0x48] sm:$0xff]  ;;  %v350_v43 = vsub.f32 %v620_v27, %v636_v33  ;;  %v351_v44 = vsub.f32 %v621_v28, %v637_v34  ;;  %v623_v45 = vld [vmem:[%s1019_s7 + $0x98] sm:$0xff]  ;;  %v283_v50 = vmul.f32 %v267_v30, %v267_v30  ;;  %p839_p6 = pneg %p838_p5 }
  0x30   : > { %v254_v40 = vld [vmem:[%s1026_s26 + $0x48] sm:$0xff]  ;;  %v639_v46 = vld [vmem:[%s1026_s26 + $0x98] sm:$0xff]  ;;  %v239_v47 = vld [vmem:[%s1019_s7 + $0x50] sm:$0xff]  ;;  %v269_v49 = vsub.f32 %v237_v29, %v253_v35  ;;  %v352_v52 = vsub.f32 %v622_v37, %v638_v38  ;;  %v284_v55 = vmul.f32 %v268_v36, %v268_v36 }
  0x31   : > { %v295_v42 = vadd.f32 %v294_v32, %v280_v25  ;;  %v255_v48 = vld [vmem:[%s1026_s26 + $0x50] sm:$0xff]  ;;  %v240_v53 = vld [vmem:[%s1019_s7 + $0x58] sm:$0xff]  ;;  %v270_v54 = vsub.f32 %v238_v39, %v254_v40  ;;  %v624_v56 = vld [vmem:[%s1019_s7 + $0xa0] sm:$0xff]  ;;  %v353_v62 = vsub.f32 %v623_v45, %v639_v46  ;;  %v366_v63 = vmul.f32 %v350_v43, %v350_v43  ;;  %p844_p13 = pnand %p843_p10, %p839_p6 }
  0x32   : > { %v640_v57 = vld [vmem:[%s1026_s26 + $0xa0] sm:$0xff]  ;;  %v256_v58 = vld [vmem:[%s1026_s26 + $0x58] sm:$0xff]  ;;  %v625_v60 = vld [vmem:[%s1019_s7 + $0xa8] sm:$0xff]  ;;  %v367_v0 = vmul.f32 %v351_v44, %v351_v44  ;;  %v271_v1 = vsub.f32 %v239_v47, %v255_v48  ;;  %v285_v5 = vmul.f32 %v269_v49, %v269_v49  ;;  %v368_v8 = vmul.f32 %v352_v52, %v352_v52 }
  0x33   : > { %v296_v51 = vadd.f32 %v295_v42, %v281_v31  ;;  %v641_v61 = vld [vmem:[%s1026_s26 + $0xa8] sm:$0xff]  ;;  %v241_v2 = vld [vmem:[%s1019_s7 + $0x60] sm:$0xff]  ;;  %v354_v7 = vsub.f32 %v624_v56, %v640_v57  ;;  %v272_v10 = vsub.f32 %v240_v53, %v256_v58  ;;  %v626_v11 = vld [vmem:[%s1019_s7 + $0xb0] sm:$0xff]  ;;  %v286_v15 = vmul.f32 %v270_v54, %v270_v54 }
  0x34   : > { %v242_v3 = vld [vmem:[%s1019_s7 + $0x68] sm:$0xff]  ;;  %v257_v4 = vld [vmem:[%s1026_s26 + $0x60] sm:$0xff]  ;;  %v642_v12 = vld [vmem:[%s1026_s26 + $0xb0] sm:$0xff]  ;;  %v355_v13 = vsub.f32 %v625_v60, %v641_v61  ;;  %v369_v19 = vmul.f32 %v353_v62, %v353_v62  ;;  %v382_v20 = vadd.f32 %v367_v0, %v366_v63  ;;  %v287_v23 = vmul.f32 %v271_v1, %v271_v1 }
  0x35   : > { %v297_v59 = vadd.f32 %v296_v51, %v282_v41  ;;  %v258_v9 = vld [vmem:[%s1026_s26 + $0x68] sm:$0xff]  ;;  %v243_v14 = vld [vmem:[%s1019_s7 + $0x70] sm:$0xff]  ;;  %v627_v17 = vld [vmem:[%s1019_s7 + $0xb8] sm:$0xff]  ;;  %v273_v22 = vsub.f32 %v241_v2, %v257_v4  ;;  %v356_v31 = vsub.f32 %v626_v11, %v642_v12  ;;  %v370_v32 = vmul.f32 %v354_v7, %v354_v7 }
  0x36   : > { %v643_v18 = vld [vmem:[%s1026_s26 + $0xb8] sm:$0xff]  ;;  %v652_v21 = vld [vmem:[%s1019_s7 + $0x100] sm:$0xff]  ;;  %v653_v24 = vld [vmem:[%s1019_s7 + $0x108] sm:$0xff]  ;;  %v383_v33 = vadd.f32 %v382_v20, %v368_v8  ;;  %v274_v34 = vsub.f32 %v242_v3, %v258_v9  ;;  %v288_v35 = vmul.f32 %v272_v10, %v272_v10  ;;  %v371_v38 = vmul.f32 %v355_v13, %v355_v13 }
  0x37   : > { %v298_v6 = vadd.f32 %v297_v59, %v283_v50  ;;  %v668_v25 = vld [vmem:[%s1026_s26 + $0x100] sm:$0xff]  ;;  %v669_v26 = vld [vmem:[%s1026_s26 + $0x108] sm:$0xff]  ;;  %v259_v27 = vld [vmem:[%s1026_s26 + $0x70] sm:$0xff]  ;;  %v357_v37 = vsub.f32 %v627_v17, %v643_v18  ;;  %v289_v50 = vmul.f32 %v273_v22, %v273_v22  ;;  %v372_v56 = vmul.f32 %v356_v31, %v356_v31 }
  0x38   : > { %v628_v29 = vld [vmem:[%s1019_s7 + $0xc0] sm:$0xff]  ;;  %v629_v36 = vld [vmem:[%s1019_s7 + $0xc8] sm:$0xff]  ;;  %v654_v39 = vld [vmem:[%s1019_s7 + $0x110] sm:$0xff]  ;;  %v384_v43 = vadd.f32 %v383_v33, %v369_v19  ;;  %v439_v46 = vsub.f32 %v652_v21, %v668_v25  ;;  %v440_v47 = vsub.f32 %v653_v24, %v669_v26  ;;  %v275_v49 = vsub.f32 %v243_v14, %v259_v27 }
  0x39   : > { %v299_v16 = vadd.f32 %v298_v6, %v284_v55  ;;  %v644_v30 = vld [vmem:[%s1026_s26 + $0xc0] sm:$0xff]  ;;  %v670_v40 = vld [vmem:[%s1026_s26 + $0x110] sm:$0xff]  ;;  %v645_v42 = vld [vmem:[%s1026_s26 + $0xc8] sm:$0xff]  ;;  %v290_v59 = vmul.f32 %v274_v34, %v274_v34  ;;  %v373_v62 = vmul.f32 %v357_v37, %v357_v37 }
  0x3a   : > { %v655_v44 = vld [vmem:[%s1019_s7 + $0x118] sm:$0xff]  ;;  %v358_v51 = vsub.f32 %v628_v29, %v644_v30  ;;  %v630_v54 = vld [vmem:[%s1019_s7 + $0xd0] sm:$0xff]  ;;  %v385_v57 = vadd.f32 %v384_v43, %v370_v32  ;;  %v441_v58 = vsub.f32 %v654_v39, %v670_v40  ;;  %v359_v61 = vsub.f32 %v629_v36, %v645_v42  ;;  %v656_v63 = vld [vmem:[%s1019_s7 + $0x120] sm:$0xff] }
  0x3b   : > { %v300_v28 = vadd.f32 %v299_v16, %v285_v5  ;;  %v671_v45 = vld [vmem:[%s1026_s26 + $0x118] sm:$0xff]  ;;  %v646_v55 = vld [vmem:[%s1026_s26 + $0xd0] sm:$0xff]  ;;  %v672_v0 = vld [vmem:[%s1026_s26 + $0x120] sm:$0xff]  ;;  %v455_v7 = vmul.f32 %v439_v46, %v439_v46  ;;  %v456_v8 = vmul.f32 %v440_v47, %v440_v47  ;;  %v291_v18 = vmul.f32 %v275_v49, %v275_v49 }
  0x3c   : > { %v244_v48 = vld [vmem:[%s1019_s7 + $0x78] sm:$0xff]  ;;  %v442_v1 = vsub.f32 %v655_v44, %v671_v45  ;;  %v386_v4 = vadd.f32 %v385_v57, %v371_v38  ;;  %v657_v5 = vld [vmem:[%s1019_s7 + $0x128] sm:$0xff]  ;;  %v360_v10 = vsub.f32 %v630_v54, %v646_v55  ;;  %v374_v11 = vmul.f32 %v358_v51, %v358_v51  ;;  %v632_v13 = vld [vmem:[%s1019_s7 + $0xe0] sm:$0xff] }
  0x3d   : > { %v301_v41 = vadd.f32 %v300_v28, %v286_v15  ;;  %v260_v52 = vld [vmem:[%s1026_s26 + $0x78] sm:$0xff]  ;;  %v673_v6 = vld [vmem:[%s1026_s26 + $0x128] sm:$0xff]  ;;  %v648_v14 = vld [vmem:[%s1026_s26 + $0xe0] sm:$0xff]  ;;  %v443_v16 = vsub.f32 %v656_v63, %v672_v0  ;;  %v457_v17 = vmul.f32 %v441_v58, %v441_v58  ;;  %v375_v21 = vmul.f32 %v359_v61, %v359_v61 }
  0x3e   : > { %v631_v60 = vld [vmem:[%s1019_s7 + $0xd8] sm:$0xff]  ;;  %v276_v9 = vsub.f32 %v244_v48, %v260_v52  ;;  %v387_v15 = vadd.f32 %v386_v4, %v372_v56  ;;  %v633_v19 = vld [vmem:[%s1019_s7 + $0xe8] sm:$0xff]  ;;  %v658_v22 = vld [vmem:[%s1019_s7 + $0x130] sm:$0xff]  ;;  %v444_v24 = vsub.f32 %v657_v5, %v673_v6  ;;  %v458_v30 = vmul.f32 %v442_v1, %v442_v1 }
  0x3f   : > { %v302_v53 = vadd.f32 %v301_v41, %v287_v23  ;;  %v647_v3 = vld [vmem:[%s1026_s26 + $0xd8] sm:$0xff]  ;;  %v674_v23 = vld [vmem:[%s1026_s26 + $0x130] sm:$0xff]  ;;  %v649_v26 = vld [vmem:[%s1026_s26 + $0xe8] sm:$0xff]  ;;  %v471_v31 = vadd.f32 %v456_v8, %v455_v7  ;;  %v362_v32 = vsub.f32 %v632_v13, %v648_v14  ;;  %v376_v33 = vmul.f32 %v360_v10, %v360_v10 }
  0x40   : > { %v361_v20 = vsub.f32 %v631_v60, %v647_v3  ;;  %v388_v27 = vadd.f32 %v387_v15, %v373_v62  ;;  %v659_v28 = vld [vmem:[%s1019_s7 + $0x138] sm:$0xff]  ;;  %v634_v34 = vld [vmem:[%s1019_s7 + $0xf0] sm:$0xff]  ;;  %v445_v37 = vsub.f32 %v658_v22, %v674_v23  ;;  %v459_v38 = vmul.f32 %v443_v16, %v443_v16  ;;  %v660_v44 = vld [vmem:[%s1019_s7 + $0x140] sm:$0xff] }
  0x41   : > { %v303_v2 = vadd.f32 %v302_v53, %v288_v35  ;;  %v675_v29 = vld [vmem:[%s1026_s26 + $0x138] sm:$0xff]  ;;  %v650_v35 = vld [vmem:[%s1026_s26 + $0xf0] sm:$0xff]  ;;  %v472_v39 = vadd.f32 %v471_v31, %v457_v17  ;;  %v292_v40 = vmul.f32 %v276_v9, %v276_v9  ;;  %v363_v42 = vsub.f32 %v633_v19, %v649_v26  ;;  %v676_v45 = vld [vmem:[%s1026_s26 + $0x140] sm:$0xff] }
  0x42   : > { %v389_v36 = vadd.f32 %v388_v27, %v374_v11  ;;  %v635_v41 = vld [vmem:[%s1019_s7 + $0xf8] sm:$0xff]  ;;  %v377_v43 = vmul.f32 %v361_v20, %v361_v20  ;;  %v446_v46 = vsub.f32 %v659_v28, %v675_v29  ;;  %v677_v51 = vld [vmem:[%s1026_s26 + $0x148] sm:$0xff]  ;;  %v460_v52 = vmul.f32 %v444_v24, %v444_v24  ;;  %v662_v62 = vld [vmem:[%s1019_s7 + $0x150] sm:$0xff] }
  0x43   : > { %v304_v12 = vadd.f32 %v303_v2, %v289_v50  ;;  %v651_v48 = vld [vmem:[%s1026_s26 + $0xf8] sm:$0xff]  ;;  %v661_v50 = vld [vmem:[%s1019_s7 + $0x148] sm:$0xff]  ;;  %v473_v53 = vadd.f32 %v472_v39, %v458_v30  ;;  %v364_v54 = vsub.f32 %v634_v34, %v650_v35  ;;  %v378_v55 = vmul.f32 %v362_v32, %v362_v32  ;;  %v678_v63 = vld [vmem:[%s1026_s26 + $0x150] sm:$0xff] }
  0x44   : > { %v390_v49 = vadd.f32 %v389_v36, %v375_v21  ;;  %v447_v57 = vsub.f32 %v660_v44, %v676_v45  ;;  %v461_v58 = vmul.f32 %v445_v37, %v445_v37  ;;  %v365_v60 = vsub.f32 %v635_v41, %v651_v48  ;;  %v663_v3 = vld [vmem:[%s1019_s7 + $0x158] sm:$0xff]  ;;  %v664_v13 = vld [vmem:[%s1019_s7 + $0x160] sm:$0xff]  ;;  %v681_v19 = vld [vmem:[%s1026_s26 + $0x168] sm:$0xff] }
  0x45   : > { %v305_v25 = vadd.f32 %v304_v12, %v290_v59  ;;  %v474_v59 = vadd.f32 %v473_v53, %v459_v38  ;;  %v379_v61 = vmul.f32 %v363_v42, %v363_v42  ;;  %v448_v0 = vsub.f32 %v661_v50, %v677_v51  ;;  %v679_v4 = vld [vmem:[%s1026_s26 + $0x158] sm:$0xff]  ;;  %v680_v14 = vld [vmem:[%s1026_s26 + $0x160] sm:$0xff]  ;;  %v666_v26 = vld [vmem:[%s1019_s7 + $0x170] sm:$0xff] }
  0x46   : > { %v391_v56 = vadd.f32 %v390_v49, %v376_v33  ;;  %v462_v5 = vmul.f32 %v446_v46, %v446_v46  ;;  %v380_v7 = vmul.f32 %v364_v54, %v364_v54  ;;  %v449_v9 = vsub.f32 %v662_v62, %v678_v63  ;;  %v682_v27 = vld [vmem:[%s1026_s26 + $0x170] sm:$0xff]  ;;  %v667_v31 = vld [vmem:[%s1019_s7 + $0x178] sm:$0xff] }
  0x47   : > { %v306_v47 = vadd.f32 %v305_v25, %v291_v18  ;;  %v475_v6 = vadd.f32 %v474_v59, %v460_v52  ;;  %v463_v10 = vmul.f32 %v447_v57, %v447_v57  ;;  %v381_v12 = vmul.f32 %v365_v60, %v365_v60  ;;  %v665_v18 = vld [vmem:[%s1019_s7 + $0x168] sm:$0xff]  ;;  %v683_v32 = vld [vmem:[%s1026_s26 + $0x178] sm:$0xff] }
  0x48   : > { %v392_v2 = vadd.f32 %v391_v56, %v377_v43  ;;  %v450_v15 = vsub.f32 %v663_v3, %v679_v4  ;;  %v464_v20 = vmul.f32 %v448_v0, %v448_v0  ;;  %v451_v23 = vsub.f32 %v664_v13, %v680_v14 }
  0x49   : > { %v307_v1 = vadd.f32 %v306_v47, %v292_v40  ;;  %v476_v11 = vadd.f32 %v475_v6, %v461_v58  ;;  %v465_v24 = vmul.f32 %v449_v9, %v449_v9  ;;  %v452_v28 = vsub.f32 %v665_v18, %v681_v19 }
  0x4a   : > { %v393_v8 = vadd.f32 %v392_v2, %v378_v55  ;;  %v466_v33 = vmul.f32 %v450_v15, %v450_v15  ;;  %v453_v36 = vsub.f32 %v666_v26, %v682_v27  ;;  %v467_v37 = vmul.f32 %v451_v23, %v451_v23 }
  0x4b   : > { %v308_v16 = vrot.slane %v307_v1, 4  ;;  %v477_v21 = vadd.f32 %v476_v11, %v462_v5  ;;  %v454_v39 = vsub.f32 %v667_v31, %v683_v32  ;;  %v468_v42 = vmul.f32 %v452_v28, %v452_v28 }
  0x4c   : > { %v394_v17 = vadd.f32 %v393_v8, %v379_v61  ;;  %v469_v45 = vmul.f32 %v453_v36, %v453_v36 }
  0x4d   : > { %v478_v25 = vadd.f32 %v477_v21, %v463_v10  ;;  %v309_v29 = vadd.f32 %v308_v16, %v307_v1  ;;  %v470_v49 = vmul.f32 %v454_v39, %v454_v39 }
  0x4e   : > { %v395_v22 = vadd.f32 %v394_v17, %v380_v7 }
  0x4f   : > { %v479_v34 = vadd.f32 %v478_v25, %v464_v20  ;;  %v310_v40 = vrot.slane %v309_v29, 2 }
  0x50   : > { %v396_v30 = vadd.f32 %v395_v22, %v381_v12 }
  0x51   : > { %v480_v38 = vadd.f32 %v479_v34, %v465_v24  ;;  %v311_v47 = vadd.f32 %v310_v40, %v309_v29 }
  0x52   : > { %v397_v35 = vrot.slane %v396_v30, 4 }
  0x53   : > { %v481_v43 = vadd.f32 %v480_v38, %v466_v33  ;;  %v312_v52 = vrot.slane %v311_v47, 1 }
  0x54   : > { %v398_v41 = vadd.f32 %v397_v35, %v396_v30 }
  0x55   : > { %v482_v46 = vadd.f32 %v481_v43, %v467_v37  ;;  %v313_v56 = vadd.f32 %v312_v52, %v311_v47 }
  0x56   : > { %v399_v44 = vrot.slane %v398_v41, 2 }
  0x57   : > { %v483_v50 = vadd.f32 %v482_v46, %v468_v42  ;;  %v314_v60 = vmul.f32 4.7672625, %v313_v56 }
  0x58   : > { %v400_v48 = vadd.f32 %v399_v44, %v398_v41 }
  0x59   : > { %v484_v51 = vadd.f32 %v483_v50, %v469_v45 }
  0x5a   : > { %v401_v53 = vrot.slane %v400_v48, 1 }
  0x5b   : > { %v485_v54 = vadd.f32 %v484_v51, %v470_v49 }
  0x5c   : > { %v402_v57 = vadd.f32 %v401_v53, %v400_v48 }
  0x5d   : > { %v486_v55 = vrot.slane %v485_v54, 4 }
  0x5e   : > { %v403_v61 = vmul.f32 4.982462, %v402_v57 }
  0x5f   : > { %v487_v58 = vadd.f32 %v486_v55, %v485_v54 }
  0x60   : > { %v404_v0 = vadd.f32 %v403_v61, %v314_v60 }
  0x61   : > { %v488_v59 = vrot.slane %v487_v58, 2 }
  0x63   : > { %v489_v62 = vadd.f32 %v488_v59, %v487_v58 }
  0x65   : > { %v490_v63 = vrot.slane %v489_v62, 1 }
  0x67   : > { %v491_v1 = vadd.f32 %v490_v63, %v489_v62 }
  0x69   : > { %v492_v2 = vmul.f32 4.9382715, %v491_v1 }
  0x6b   : > { %v493_v3 = vadd.f32 %v492_v2, %v404_v0 }
  0x6d   : > { %494 = vst [vmem:[%s226_s8] sm:$0x1] %v493_v3 }
  0x6e   : > { %847 = shalt.err (!%p844_p13)
}
  0x6f   : > { %695 = dma.vmem_to_hbm [thread:$0]  (%p976_p9), %s508_s15, 16, %s510_s16, %s496_s18  }
  0x70 PF: > { %s521_s4 = sand.u32 1, %s886_s9   ;;  %p705_p0 = pnand %p616_p12, %p983_p11 }
  0x71   : > { %s522_s6 = scalar_lea.sflag [#allocation4], %s521_s4 }
  0x72   : > { %p706_p1 = pneg %p705_p0 }
  0x74   : > { %881 = dma.done.wait (%p706_p1), %s522_s6, 16  }
  0x75   : > { %883 = vsyncadd (%p706_p1), %s522_s6, 4294967280  ;;  %s21_s14 = sadd.s32 1, %s906_s14   ;;  %s1175_s9 = smov %s890_s10 }
  0x76   : > { %p18_p2 = scmp.ge.s32.totalorder %s21_s14, 4   ;;  %s1176_s10 = smov %s894_s11 }
  0x77   : > { %s1177_s11 = smov %s981_s23  ;;  %s1178_s12 = smov %s902_s13 }
  0x78   : > { %s1179_s13 = smov %s1181_s17  ;;  %20 = sbr.rel (!%p18_p2) target bundleno = 8 (0x8), region = 90 }
  0x7d   :  { %527 = vsyncpa [#allocation3], 1 }
  0x7e   :  { %529 = vsyncpa [#allocation3 + $0x1], 1 }
  0x7f   :  { %530 = vsyncpa [#allocation6], 1 }
  0x80   :  { %532 = vsyncpa [#allocation6 + $0x1], 1 }
  0x81   :  { %533 = vsyncpa [#allocation4], 1 }
  0x82   :  { %535 = vsyncpa [#allocation4 + $0x1], 1 }

</bundles_post_ra>
